<compile_context>
chip_gen: v7x
topology: tpu7x:2x2x1
jax: 0.10.0
libtpu: 0.0.40
codegen_flags: <defaults>
</compile_context>

<pallas_src>
import functools
import math

import jax
import jax.numpy as jnp
from jax.experimental import pallas as pl
from jax.experimental.pallas import tpu as pltpu


_ROW_ALIGN = 16  # row alignment safe for bf16 (16, 128) tiling (covers f32 (8, 128))


def _rup(x, m):
    return (x + m - 1) // m * m


def make_layout(embed_dim, n_actions, gru_dim, hidden_dim):
    """Static packing layout for the bf16 weight slab / f32 bias slab.

    Row bands (each 16-row aligned):
      band 0 rows [0, in_x_pad)       : [ wi_r | wi_z | wi_n | w1x ]   (x-side, fused dot)
      band 1 rows [r_wh, r_wh+g_pad)  : [ wh_r | wh_z | wh_n | w1h ]
      band 2 rows [r_deep, +lat_pad)  : [ w2   | w3   | w4   | w5  ]
    Every sub-block sits on a 128-lane column boundary.
    """
    in_x = embed_dim + n_actions
    in_x_pad = _rup(in_x, _ROW_ALIGN)
    latent = gru_dim + hidden_dim
    out_dim = embed_dim + 1
    g_pad = _rup(gru_dim, 128)
    lat_pad = _rup(latent, 128)
    out_pad = _rup(out_dim, 128)
    r_wh = in_x_pad
    r_deep = r_wh + g_pad
    slab_rows = r_deep + lat_pad
    slab_cols = max(3 * g_pad + lat_pad, 3 * lat_pad + out_pad)
    return dict(
        in_x=in_x, in_x_pad=in_x_pad, gru_dim=gru_dim, g_pad=g_pad,
        latent=latent, lat_pad=lat_pad, out_dim=out_dim, out_pad=out_pad,
        r_wh=r_wh, r_deep=r_deep, slab_rows=slab_rows, slab_cols=slab_cols,
    )


def pack_params(raw, layout):
    """Pack raw per-matrix params into (bf16 weight slab, f32 bias slab)."""
    g = layout["gru_dim"]
    g_pad, lat_pad = layout["g_pad"], layout["lat_pad"]
    latent, out_dim = layout["latent"], layout["out_dim"]
    in_x = layout["in_x"]
    r_wh, r_deep = layout["r_wh"], layout["r_deep"]

    W = jnp.zeros((layout["slab_rows"], layout["slab_cols"]), jnp.float32)
    # band 0: GRU input gates (each 128-lane padded) + MLP layer-1 x-part
    for k in range(3):
        W = W.at[0:in_x, k * g_pad:k * g_pad + g].set(raw["wi"][:, k * g:(k + 1) * g])
    W = W.at[0:in_x, 3 * g_pad:3 * g_pad + latent].set(raw["w1x"])
    # band 1: GRU hidden gates + MLP layer-1 h-part
    for k in range(3):
        W = W.at[r_wh:r_wh + g, k * g_pad:k * g_pad + g].set(raw["wh"][:, k * g:(k + 1) * g])
    W = W.at[r_wh:r_wh + g, 3 * g_pad:3 * g_pad + latent].set(raw["w1h"])
    # band 2: deep MLP layers
    W = W.at[r_deep:r_deep + latent, 0:latent].set(raw["w2"])
    W = W.at[r_deep:r_deep + latent, lat_pad:lat_pad + latent].set(raw["w3"])
    W = W.at[r_deep:r_deep + latent, 2 * lat_pad:2 * lat_pad + latent].set(raw["w4"])
    W = W.at[r_deep:r_deep + latent, 3 * lat_pad:3 * lat_pad + out_dim].set(raw["w5"])
    W = W.astype(jnp.bfloat16)

    B = jnp.zeros((8, layout["slab_cols"]), jnp.float32)
    for k in range(3):
        B = B.at[0, k * g_pad:k * g_pad + g].set(raw["b_ih"][k * g:(k + 1) * g])
        B = B.at[1, k * g_pad:k * g_pad + g].set(raw["b_hh"][k * g:(k + 1) * g])
    B = B.at[2, 0:latent].set(raw["b1"])
    B = B.at[3, 0:latent].set(raw["b2"])
    B = B.at[4, 0:latent].set(raw["b3"])
    B = B.at[5, 0:latent].set(raw["b4"])
    B = B.at[6, 0:out_dim].set(raw["b5"])
    return W, B


def _transition_kernel(x_ref, h0_ref, w_ref, b_ref, out_ref, h_out_ref, h_scr, *,
                       in_x_pad, g_pad, lat_pad, out_pad, r_wh, r_deep):
    f32 = jnp.float32
    bf16 = jnp.bfloat16
    gate3 = 3 * g_pad

    # Initialize the carried hidden state from the (resident) h0 block.
    @pl.when(pl.program_id(0) == 0)
    def _():
        h_scr[...] = h0_ref[...]

    x_bf = x_ref[0].astype(bf16)                       # (B, in_x_pad)
    h = h_scr[...]                                     # (B, g_pad) f32, padded lanes == 0
    h_bf = h.astype(bf16)

    # ---- fused x-side matmul: GRU input gates r|z|n (128-lane tiles) + layer-1 x-part ----
    gi = jnp.dot(x_bf, w_ref[0:in_x_pad, :], preferred_element_type=f32) + b_ref[0:1, :]
    # ---- GRU hidden-side matmul (gates fused) ----
    gh = jnp.dot(h_bf, w_ref[r_wh:r_wh + g_pad, 0:gate3],
                 preferred_element_type=f32) + b_ref[1:2, 0:gate3]

    # nn.GRUCell semantics (gate order r | z | n); all slices are 128-aligned tiles.
    r = jax.nn.sigmoid(gi[:, 0:g_pad] + gh[:, 0:g_pad])
    z = jax.nn.sigmoid(gi[:, g_pad:2 * g_pad] + gh[:, g_pad:2 * g_pad])
    n = jnp.tanh(gi[:, 2 * g_pad:gate3] + r * gh[:, 2 * g_pad:gate3])
    h_new = (1.0 - z) * n + z * h                      # padded lanes stay exactly 0
    h_scr[...] = h_new
    h_out_ref[0] = h_new.astype(h_out_ref.dtype)       # lane-dense (B, 128) store

    # ---- MLP on cat([h_new, x]); x-part already computed in gi tail ----
    x1 = gi[:, gate3:gate3 + lat_pad]
    a = jnp.tanh(
        jnp.dot(h_new.astype(bf16), w_ref[r_wh:r_wh + g_pad, gate3:gate3 + lat_pad],
                preferred_element_type=f32)
        + x1 + b_ref[2:3, 0:lat_pad])
    a = jnp.tanh(
        jnp.dot(a.astype(bf16), w_ref[r_deep:r_deep + lat_pad, 0:lat_pad],
                preferred_element_type=f32) + b_ref[3:4, 0:lat_pad])
    a = jnp.tanh(
        jnp.dot(a.astype(bf16), w_ref[r_deep:r_deep + lat_pad, lat_pad:2 * lat_pad],
                preferred_element_type=f32) + b_ref[4:5, 0:lat_pad])
    a = jnp.dot(a.astype(bf16), w_ref[r_deep:r_deep + lat_pad, 2 * lat_pad:3 * lat_pad],
                preferred_element_type=f32) + b_ref[5:6, 0:lat_pad]     # no activation
    out = jnp.dot(a.astype(bf16),
                  w_ref[r_deep:r_deep + lat_pad, 3 * lat_pad:3 * lat_pad + out_pad],
                  preferred_element_type=f32) + b_ref[6:7, 0:out_pad]
    out_ref[0] = out.astype(out_ref.dtype)             # lane-dense store


def transition_rollout(xs, hidden, w_slab, b_slab, layout):
    """Multi-step rollout.  xs: (T, B, embed+n_actions), hidden: (B, gru_dim).

    Returns (outs (T, B, embed+1), h_seq (T, B, gru_dim)) with h carried in VMEM
    scratch across the T grid steps; weights stay resident across the rollout.
    """
    T, batch, in_x = xs.shape
    assert in_x == layout["in_x"]
    in_x_pad, g_pad = layout["in_x_pad"], layout["g_pad"]
    g, out_pad, out_dim = layout["gru_dim"], layout["out_pad"], layout["out_dim"]

    b_pad = _rup(batch, 8)
    xs = xs.astype(jnp.float32)
    hidden = hidden.astype(jnp.float32)
    if in_x_pad != in_x or b_pad != batch:
        xs = jnp.pad(xs, ((0, 0), (0, b_pad - batch), (0, in_x_pad - in_x)))
    if g_pad != g or b_pad != batch:
        hidden = jnp.pad(hidden, ((0, b_pad - batch), (0, g_pad - g)))

    kernel = functools.partial(
        _transition_kernel,
        in_x_pad=in_x_pad, g_pad=g_pad, lat_pad=layout["lat_pad"],
        out_pad=out_pad, r_wh=layout["r_wh"], r_deep=layout["r_deep"])

    out_full, h_full = pl.pallas_call(
        kernel,
        out_shape=(jax.ShapeDtypeStruct((T, b_pad, out_pad), jnp.float32),
                   jax.ShapeDtypeStruct((T, b_pad, g_pad), jnp.float32)),
        grid_spec=pltpu.PrefetchScalarGridSpec(
            num_scalar_prefetch=0,
            grid=(T,),
            in_specs=[
                pl.BlockSpec((1, b_pad, in_x_pad), lambda t: (t, 0, 0)),     # x per step
                pl.BlockSpec((b_pad, g_pad), lambda t: (0, 0)),              # h0 (resident)
                pl.BlockSpec((layout["slab_rows"], layout["slab_cols"]),
                             lambda t: (0, 0)),                              # weights (resident)
                pl.BlockSpec((8, layout["slab_cols"]), lambda t: (0, 0)),    # biases (resident)
            ],
            out_specs=(
                pl.BlockSpec((1, b_pad, out_pad), lambda t: (t, 0, 0)),
                pl.BlockSpec((1, b_pad, g_pad), lambda t: (t, 0, 0)),
            ),
            scratch_shapes=[pltpu.VMEM((b_pad, g_pad), jnp.float32)],        # carried h
        ),
        compiler_params=pltpu.CompilerParams(dimension_semantics=("arbitrary",)),
    )(xs, hidden, w_slab, b_slab)
    return out_full[:, :batch, :out_dim], h_full[:, :batch, :g]


def transition_forward(x, hidden, w_slab, b_slab, layout):
    """Single-step forward matching the module: (out, h_new)."""
    outs, hs = transition_rollout(x[None], hidden, w_slab, b_slab, layout)
    return outs[0], hs[0]


def init_params(key, embed_dim, n_actions, gru_dim, hidden_dim):
    """Deterministic synthetic parameters matching the module's shapes.

    Weights are rounded to the bf16 grid (stored f32) so the bf16 kernel slab
    and the reference use bit-identical weight values.
    """
    in_x = embed_dim + n_actions
    latent = gru_dim + hidden_dim
    mlp_in = gru_dim + in_x
    out_dim = embed_dim + 1

    keys = iter(jax.random.split(key, 24))

    def uni(shape, fan_in):
        bound = 1.0 / math.sqrt(fan_in)
        return jax.random.uniform(next(keys), shape, jnp.float32, -bound, bound)

    def wq(shape, fan_in):
        return uni(shape, fan_in).astype(jnp.bfloat16).astype(jnp.float32)

    p = {}
    # GRU cell (pre-transposed, gates concatenated along columns as r|z|n)
    p["wi"] = wq((in_x, 3 * gru_dim), gru_dim)
    p["wh"] = wq((gru_dim, 3 * gru_dim), gru_dim)
    p["b_ih"] = uni((3 * gru_dim,), gru_dim)
    p["b_hh"] = uni((3 * gru_dim,), gru_dim)
    # MLP (nn.Linear weights stored transposed, shape (in, out)); layer 1 split h/x
    w1 = wq((mlp_in, latent), mlp_in)
    p["w1h"], p["w1x"] = w1[:gru_dim], w1[gru_dim:]
    p["b1"] = uni((latent,), mlp_in)
    for i, name in ((2, "w2"), (3, "w3"), (4, "w4")):
        p[name] = wq((latent, latent), latent)
        p[f"b{i}"] = uni((latent,), latent)
    p["w5"] = wq((latent, out_dim), latent)
    p["b5"] = uni((out_dim,), latent)
    return p


def reference_forward(x, h, p):
    """Pure-JAX reference mirroring the module; matmuls use the same bf16-in /
    f32-accumulate convention as the kernel so the comparison can be tight."""
    bf16, f32 = jnp.bfloat16, jnp.float32

    def mm(a, w):
        return jnp.dot(a.astype(bf16), w.astype(bf16), preferred_element_type=f32)

    g = h.shape[1]
    gi = mm(x, p["wi"]) + p["b_ih"]
    gh = mm(h, p["wh"]) + p["b_hh"]
    r = jax.nn.sigmoid(gi[:, :g] + gh[:, :g])
    z = jax.nn.sigmoid(gi[:, g:2 * g] + gh[:, g:2 * g])
    n = jnp.tanh(gi[:, 2 * g:] + r * gh[:, 2 * g:])
    h_new = (1.0 - z) * n + z * h
    a = jnp.tanh(mm(h_new, p["w1h"]) + mm(x, p["w1x"]) + p["b1"])
    a = jnp.tanh(mm(a, p["w2"]) + p["b2"])
    a = jnp.tanh(mm(a, p["w3"]) + p["b3"])
    a = mm(a, p["w4"]) + p["b4"]
    out = mm(a, p["w5"]) + p["b5"]
    return out, h_new


if __name__ == "__main__":
    # Small config consistent with the module:
    embed_dim, n_actions = 32, 4
    gru_dim, hidden_dim = 32, 32      # config['gru_dim'], config['hidden_dim']
    batch, T = 8, 6

    key = jax.random.PRNGKey(0)
    k_x, k_h, k_p = jax.random.split(key, 3)
    xs = jax.random.normal(k_x, (T, batch, embed_dim + n_actions), jnp.float32)
    hidden = jax.random.normal(k_h, (batch, gru_dim), jnp.float32)

    raw = init_params(k_p, embed_dim, n_actions, gru_dim, hidden_dim)
    layout = make_layout(embed_dim, n_actions, gru_dim, hidden_dim)
    w_slab, b_slab = pack_params(raw, layout)

    # --- single-step forward (module semantics) ---
    out1, h1 = transition_forward(xs[0], hidden, w_slab, b_slab, layout)
    jax.block_until_ready((out1, h1))
    ref_out1, ref_h1 = reference_forward(xs[0], hidden, raw)
    assert out1.shape == (batch, embed_dim + 1) and h1.shape == (batch, gru_dim)
    assert jnp.allclose(out1, ref_out1, atol=5e-4, rtol=1e-3), \
        float(jnp.max(jnp.abs(out1 - ref_out1)))
    assert jnp.allclose(h1, ref_h1, atol=5e-4, rtol=1e-3), \
        float(jnp.max(jnp.abs(h1 - ref_h1)))

    # --- multi-step rollout (weights resident, h carried in VMEM scratch) ---
    outs, hs = transition_rollout(xs, hidden, w_slab, b_slab, layout)
    jax.block_until_ready((outs, hs))
    h_ref = hidden
    for t in range(T):
        ref_o, h_ref = reference_forward(xs[t], h_ref, raw)
        assert jnp.allclose(outs[t], ref_o, atol=1e-3, rtol=2e-3), \
            (t, float(jnp.max(jnp.abs(outs[t] - ref_o))))
        assert jnp.allclose(hs[t], h_ref, atol=1e-3, rtol=2e-3), \
            (t, float(jnp.max(jnp.abs(hs[t] - h_ref))))

    print("KERNEL_OK")
</pallas_src>

<mosaic_0001>
module attributes {stable_mosaic.version = 11 : i64} {
  func.func @_transition_kernel(%arg0: i32, %arg1: memref<1x8x48xf32, #tpu.memory_space<vmem>>, %arg2: memref<8x128xf32, #tpu.memory_space<vmem>>, %arg3: memref<304x512xbf16, #tpu.memory_space<vmem>>, %arg4: memref<8x512xf32, #tpu.memory_space<vmem>>, %arg5: memref<1x8x128xf32, #tpu.memory_space<vmem>>, %arg6: memref<1x8x128xf32, #tpu.memory_space<vmem>>, %arg7: memref<8x128xf32, #tpu.memory_space<vmem>>) attributes {dimension_semantics = [#tpu.dimension_semantics<arbitrary>], iteration_bounds = array<i64: 1>, scalar_prefetch = 0 : i64, scratch_operands = 1 : i64, tpu.core_type = #tpu.core_type<tc>, window_params = [{transform_indices = @transform_0, window_bounds = array<i64: 1, 8, 48>}, {pipeline_mode = #tpu.pipeline_mode<synchronous>, transform_indices = @transform_1, window_bounds = array<i64: 8, 128>}, {pipeline_mode = #tpu.pipeline_mode<synchronous>, transform_indices = @transform_2, window_bounds = array<i64: 304, 512>}, {pipeline_mode = #tpu.pipeline_mode<synchronous>, transform_indices = @transform_3, window_bounds = array<i64: 8, 512>}, {transform_indices = @transform_4, window_bounds = array<i64: 1, 8, 128>}, {transform_indices = @transform_5, window_bounds = array<i64: 1, 8, 128>}]} {
    %c0_i32 = arith.constant 0 : i32
    %0 = arith.cmpi eq, %arg0, %c0_i32 : i32
    %1 = arith.extui %0 : i1 to i32
    %c0_i32_0 = arith.constant 0 : i32
    %2 = arith.cmpi ne, %1, %c0_i32_0 : i32
    scf.if %2 {
      %c0_39 = arith.constant 0 : index
      %c0_40 = arith.constant 0 : index
      %86 = vector.load %arg2[%c0_39, %c0_40] : memref<8x128xf32, #tpu.memory_space<vmem>>, vector<8x128xf32>
      %c0_41 = arith.constant 0 : index
      %c0_42 = arith.constant 0 : index
      %87 = vector.load %arg7[%c0_41, %c0_42] : memref<8x128xf32, #tpu.memory_space<vmem>>, vector<8x128xf32>
      tpu.vector_store %arg7[%c0_41, %c0_42], %86 {strides = array<i32>} : memref<8x128xf32, #tpu.memory_space<vmem>>, vector<8x128xf32>,
    } else {
    }
    %c0 = arith.constant 0 : index
    %c0_1 = arith.constant 0 : index
    %c0_2 = arith.constant 0 : index
    %3 = vector.load %arg1[%c0, %c0_1, %c0_2] : memref<1x8x48xf32, #tpu.memory_space<vmem>>, vector<1x8x48xf32>
    %4 = vector.shape_cast %3 : vector<1x8x48xf32> to vector<8x48xf32>
    %5 = arith.truncf %4 : vector<8x48xf32> to vector<8x48xbf16>
    %c0_3 = arith.constant 0 : index
    %c0_4 = arith.constant 0 : index
    %6 = vector.load %arg7[%c0_3, %c0_4] : memref<8x128xf32, #tpu.memory_space<vmem>>, vector<8x128xf32>
    %7 = arith.truncf %6 : vector<8x128xf32> to vector<8x128xbf16>
    %c0_5 = arith.constant 0 : index
    %c0_6 = arith.constant 0 : index
    %8 = vector.load %arg3[%c0_5, %c0_6] : memref<304x512xbf16, #tpu.memory_space<vmem>>, vector<48x512xbf16>
    %cst = arith.constant dense<0.000000e+00> : vector<8x512xf32>
    %9 = tpu.matmul %5, %8, %cst {dimension_numbers = #tpu.dot_dimension_numbers<[1], [0], [0], [1], [0, 0, 1, 1], [], []>} : vector<8x48xbf16>, vector<48x512xbf16>, vector<8x512xf32> -> vector<8x512xf32>
    %c0_7 = arith.constant 0 : index
    %c0_8 = arith.constant 0 : index
    %10 = vector.load %arg4[%c0_7, %c0_8] : memref<8x512xf32, #tpu.memory_space<vmem>>, vector<1x512xf32>
    %11 = vector.broadcast %10 : vector<1x512xf32> to vector<8x512xf32>
    %12 = arith.addf %9, %11 : vector<8x512xf32>
    %c48 = arith.constant 48 : index
    %c0_9 = arith.constant 0 : index
    %13 = vector.load %arg3[%c48, %c0_9] : memref<304x512xbf16, #tpu.memory_space<vmem>>, vector<128x384xbf16>
    %cst_10 = arith.constant dense<0.000000e+00> : vector<8x384xf32>
    %14 = tpu.matmul %7, %13, %cst_10 {dimension_numbers = #tpu.dot_dimension_numbers<[1], [0], [0], [1], [0, 0, 1, 1], [], []>} : vector<8x128xbf16>, vector<128x384xbf16>, vector<8x384xf32> -> vector<8x384xf32>
    %c1 = arith.constant 1 : index
    %c0_11 = arith.constant 0 : index
    %15 = vector.load %arg4[%c1, %c0_11] : memref<8x512xf32, #tpu.memory_space<vmem>>, vector<1x384xf32>
    %16 = vector.broadcast %15 : vector<1x384xf32> to vector<8x384xf32>
    %17 = arith.addf %14, %16 : vector<8x384xf32>
    %18 = vector.extract_strided_slice %12 {offsets = [0, 0], sizes = [8, 128], strides = [1, 1]} : vector<8x512xf32> to vector<8x128xf32>
    %19 = vector.extract_strided_slice %17 {offsets = [0, 0], sizes = [8, 128], strides = [1, 1]} : vector<8x384xf32> to vector<8x128xf32>
    %20 = arith.addf %18, %19 : vector<8x128xf32>
    %21 = arith.negf %20 : vector<8x128xf32>
    %22 = math.exp %21 : vector<8x128xf32>
    %cst_12 = arith.constant 1.000000e+00 : f32
    %23 = vector.broadcast %cst_12 : f32 to vector<8x128xf32>
    %24 = arith.addf %23, %22 : vector<8x128xf32>
    %25 = arith.divf %23, %24 : vector<8x128xf32>
    %26 = vector.extract_strided_slice %12 {offsets = [0, 128], sizes = [8, 128], strides = [1, 1]} : vector<8x512xf32> to vector<8x128xf32>
    %27 = vector.extract_strided_slice %17 {offsets = [0, 128], sizes = [8, 128], strides = [1, 1]} : vector<8x384xf32> to vector<8x128xf32>
    %28 = arith.addf %26, %27 : vector<8x128xf32>
    %29 = arith.negf %28 : vector<8x128xf32>
    %30 = math.exp %29 : vector<8x128xf32>
    %cst_13 = arith.constant 1.000000e+00 : f32
    %31 = vector.broadcast %cst_13 : f32 to vector<8x128xf32>
    %32 = arith.addf %31, %30 : vector<8x128xf32>
    %33 = arith.divf %31, %32 : vector<8x128xf32>
    %34 = vector.extract_strided_slice %12 {offsets = [0, 256], sizes = [8, 128], strides = [1, 1]} : vector<8x512xf32> to vector<8x128xf32>
    %35 = vector.extract_strided_slice %17 {offsets = [0, 256], sizes = [8, 128], strides = [1, 1]} : vector<8x384xf32> to vector<8x128xf32>
    %36 = arith.mulf %25, %35 : vector<8x128xf32>
    %37 = arith.addf %34, %36 : vector<8x128xf32>
    %38 = math.tanh %37 : vector<8x128xf32>
    %cst_14 = arith.constant 1.000000e+00 : f32
    %39 = vector.broadcast %cst_14 : f32 to vector<8x128xf32>
    %40 = arith.subf %39, %33 : vector<8x128xf32>
    %41 = arith.mulf %40, %38 : vector<8x128xf32>
    %42 = arith.mulf %33, %6 : vector<8x128xf32>
    %43 = arith.addf %41, %42 : vector<8x128xf32>
    %c0_15 = arith.constant 0 : index
    %c0_16 = arith.constant 0 : index
    %44 = vector.load %arg7[%c0_15, %c0_16] : memref<8x128xf32, #tpu.memory_space<vmem>>, vector<8x128xf32>
    tpu.vector_store %arg7[%c0_15, %c0_16], %43 {strides = array<i32>} : memref<8x128xf32, #tpu.memory_space<vmem>>, vector<8x128xf32>,
    %c0_17 = arith.constant 0 : index
    %c0_18 = arith.constant 0 : index
    %c0_19 = arith.constant 0 : index
    %45 = vector.load %arg6[%c0_17, %c0_18, %c0_19] : memref<1x8x128xf32, #tpu.memory_space<vmem>>, vector<1x8x128xf32>
    %46 = vector.shape_cast %45 : vector<1x8x128xf32> to vector<8x128xf32>
    %47 = vector.shape_cast %43 : vector<8x128xf32> to vector<1x8x128xf32>
    tpu.vector_store %arg6[%c0_17, %c0_18, %c0_19], %47 {strides = array<i32>} : memref<1x8x128xf32, #tpu.memory_space<vmem>>, vector<1x8x128xf32>,
    %48 = vector.extract_strided_slice %12 {offsets = [0, 384], sizes = [8, 128], strides = [1, 1]} : vector<8x512xf32> to vector<8x128xf32>
    %49 = arith.truncf %43 : vector<8x128xf32> to vector<8x128xbf16>
    %c48_20 = arith.constant 48 : index
    %c384 = arith.constant 384 : index
    %50 = vector.load %arg3[%c48_20, %c384] : memref<304x512xbf16, #tpu.memory_space<vmem>>, vector<128x128xbf16>
    %cst_21 = arith.constant dense<0.000000e+00> : vector<8x128xf32>
    %51 = tpu.matmul %49, %50, %cst_21 {dimension_numbers = #tpu.dot_dimension_numbers<[1], [0], [0], [1], [0, 0, 1, 1], [], []>} : vector<8x128xbf16>, vector<128x128xbf16>, vector<8x128xf32> -> vector<8x128xf32>
    %52 = arith.addf %51, %48 : vector<8x128xf32>
    %c2 = arith.constant 2 : index
    %c0_22 = arith.constant 0 : index
    %53 = vector.load %arg4[%c2, %c0_22] : memref<8x512xf32, #tpu.memory_space<vmem>>, vector<1x128xf32>
    %54 = vector.broadcast %53 : vector<1x128xf32> to vector<8x128xf32>
    %55 = arith.addf %52, %54 : vector<8x128xf32>
    %56 = math.tanh %55 : vector<8x128xf32>
    %57 = arith.truncf %56 : vector<8x128xf32> to vector<8x128xbf16>
    %c176 = arith.constant 176 : index
    %c0_23 = arith.constant 0 : index
    %58 = vector.load %arg3[%c176, %c0_23] : memref<304x512xbf16, #tpu.memory_space<vmem>>, vector<128x128xbf16>
    %cst_24 = arith.constant dense<0.000000e+00> : vector<8x128xf32>
    %59 = tpu.matmul %57, %58, %cst_24 {dimension_numbers = #tpu.dot_dimension_numbers<[1], [0], [0], [1], [0, 0, 1, 1], [], []>} : vector<8x128xbf16>, vector<128x128xbf16>, vector<8x128xf32> -> vector<8x128xf32>
    %c3 = arith.constant 3 : index
    %c0_25 = arith.constant 0 : index
    %60 = vector.load %arg4[%c3, %c0_25] : memref<8x512xf32, #tpu.memory_space<vmem>>, vector<1x128xf32>
    %61 = vector.broadcast %60 : vector<1x128xf32> to vector<8x128xf32>
    %62 = arith.addf %59, %61 : vector<8x128xf32>
    %63 = math.tanh %62 : vector<8x128xf32>
    %64 = arith.truncf %63 : vector<8x128xf32> to vector<8x128xbf16>
    %c176_26 = arith.constant 176 : index
    %c128 = arith.constant 128 : index
    %65 = vector.load %arg3[%c176_26, %c128] : memref<304x512xbf16, #tpu.memory_space<vmem>>, vector<128x128xbf16>
    %cst_27 = arith.constant dense<0.000000e+00> : vector<8x128xf32>
    %66 = tpu.matmul %64, %65, %cst_27 {dimension_numbers = #tpu.dot_dimension_numbers<[1], [0], [0], [1], [0, 0, 1, 1], [], []>} : vector<8x128xbf16>, vector<128x128xbf16>, vector<8x128xf32> -> vector<8x128xf32>
    %c4 = arith.constant 4 : index
    %c0_28 = arith.constant 0 : index
    %67 = vector.load %arg4[%c4, %c0_28] : memref<8x512xf32, #tpu.memory_space<vmem>>, vector<1x128xf32>
    %68 = vector.broadcast %67 : vector<1x128xf32> to vector<8x128xf32>
    %69 = arith.addf %66, %68 : vector<8x128xf32>
    %70 = math.tanh %69 : vector<8x128xf32>
    %71 = arith.truncf %70 : vector<8x128xf32> to vector<8x128xbf16>
    %c176_29 = arith.constant 176 : index
    %c256 = arith.constant 256 : index
    %72 = vector.load %arg3[%c176_29, %c256] : memref<304x512xbf16, #tpu.memory_space<vmem>>, vector<128x128xbf16>
    %cst_30 = arith.constant dense<0.000000e+00> : vector<8x128xf32>
    %73 = tpu.matmul %71, %72, %cst_30 {dimension_numbers = #tpu.dot_dimension_numbers<[1], [0], [0], [1], [0, 0, 1, 1], [], []>} : vector<8x128xbf16>, vector<128x128xbf16>, vector<8x128xf32> -> vector<8x128xf32>
    %c5 = arith.constant 5 : index
    %c0_31 = arith.constant 0 : index
    %74 = vector.load %arg4[%c5, %c0_31] : memref<8x512xf32, #tpu.memory_space<vmem>>, vector<1x128xf32>
    %75 = vector.broadcast %74 : vector<1x128xf32> to vector<8x128xf32>
    %76 = arith.addf %73, %75 : vector<8x128xf32>
    %77 = arith.truncf %76 : vector<8x128xf32> to vector<8x128xbf16>
    %c176_32 = arith.constant 176 : index
    %c384_33 = arith.constant 384 : index
    %78 = vector.load %arg3[%c176_32, %c384_33] : memref<304x512xbf16, #tpu.memory_space<vmem>>, vector<128x128xbf16>
    %cst_34 = arith.constant dense<0.000000e+00> : vector<8x128xf32>
    %79 = tpu.matmul %77, %78, %cst_34 {dimension_numbers = #tpu.dot_dimension_numbers<[1], [0], [0], [1], [0, 0, 1, 1], [], []>} : vector<8x128xbf16>, vector<128x128xbf16>, vector<8x128xf32> -> vector<8x128xf32>
    %c6 = arith.constant 6 : index
    %c0_35 = arith.constant 0 : index
    %80 = vector.load %arg4[%c6, %c0_35] : memref<8x512xf32, #tpu.memory_space<vmem>>, vector<1x128xf32>
    %81 = vector.broadcast %80 : vector<1x128xf32> to vector<8x128xf32>
    %82 = arith.addf %79, %81 : vector<8x128xf32>
    %c0_36 = arith.constant 0 : index
    %c0_37 = arith.constant 0 : index
    %c0_38 = arith.constant 0 : index
    %83 = vector.load %arg5[%c0_36, %c0_37, %c0_38] : memref<1x8x128xf32, #tpu.memory_space<vmem>>, vector<1x8x128xf32>
    %84 = vector.shape_cast %83 : vector<1x8x128xf32> to vector<8x128xf32>
    %85 = vector.shape_cast %82 : vector<8x128xf32> to vector<1x8x128xf32>
    tpu.vector_store %arg5[%c0_36, %c0_37, %c0_38], %85 {strides = array<i32>} : memref<1x8x128xf32, #tpu.memory_space<vmem>>, vector<1x8x128xf32>,
    return
  }
  func.func @transform_0(%arg0: i32) -> (i32, i32, i32) {
    %c0_i32 = arith.constant 0 : i32
    %c0_i32_0 = arith.constant 0 : i32
    %c0_i32_1 = arith.constant 0 : i32
    return %arg0, %c0_i32, %c0_i32_0 : i32, i32, i32
  }
  func.func @transform_1(%arg0: i32) -> (i32, i32) {
    %c0_i32 = arith.constant 0 : i32
    %c0_i32_0 = arith.constant 0 : i32
    %c0_i32_1 = arith.constant 0 : i32
    return %c0_i32, %c0_i32_0 : i32, i32
  }
  func.func @transform_2(%arg0: i32) -> (i32, i32) {
    %c0_i32 = arith.constant 0 : i32
    %c0_i32_0 = arith.constant 0 : i32
    %c0_i32_1 = arith.constant 0 : i32
    return %c0_i32, %c0_i32_0 : i32, i32
  }
  func.func @transform_3(%arg0: i32) -> (i32, i32) {
    %c0_i32 = arith.constant 0 : i32
    %c0_i32_0 = arith.constant 0 : i32
    %c0_i32_1 = arith.constant 0 : i32
    return %c0_i32, %c0_i32_0 : i32, i32
  }
  func.func @transform_4(%arg0: i32) -> (i32, i32, i32) {
    %c0_i32 = arith.constant 0 : i32
    %c0_i32_0 = arith.constant 0 : i32
    %c0_i32_1 = arith.constant 0 : i32
    return %arg0, %c0_i32, %c0_i32_0 : i32, i32, i32
  }
  func.func @transform_5(%arg0: i32) -> (i32, i32, i32) {
    %c0_i32 = arith.constant 0 : i32
    %c0_i32_0 = arith.constant 0 : i32
    %c0_i32_1 = arith.constant 0 : i32
    return %arg0, %c0_i32, %c0_i32_0 : i32, i32, i32
  }
}

</mosaic_0001>

<bundles_post_ra>
// kernel: tpu_custom_call.1
= control target key start
LH: loop header
LB: loop body
LE: loop exit
PB: predicated region body
PF: predicated region fallthrough
CT: control target
= control target key end

     0   :  { %11 = vsyncpa [#allocation4], 0  ;;  %s1823_s0 = inlined_call_operand.hbm [shape: f32[1,8,48], index: 0, kind: input, shape index: {}]   ;;  %s1824_s1 = inlined_call_operand.hbm [shape: f32[8,128], index: 1, kind: input, shape index: {}]   ;;  %s1825_s2 = inlined_call_operand.hbm [shape: bf16[304,512], index: 2, kind: input, shape index: {}]   ;;  %s1826_s3 = inlined_call_operand.hbm [shape: f32[8,512], index: 3, kind: input, shape index: {}]   ;;  %s1827_s4 = inlined_call_operand.hbm [shape: f32[1,8,128], index: 4, kind: output, shape index: {0}]   ;;  %s1828_s5 = inlined_call_operand.hbm [shape: f32[1,8,128], index: 5, kind: output, shape index: {1}]  }
   0x1   :  { %12 = vsyncpa [#allocation7], 0 }
   0x2   :  { %13 = vsyncpa [#allocation10], 0 }
   0x3   :  { %14 = vsyncpa [#allocation5], 0 }
   0x4   :  { %15 = vsyncpa [#allocation13], 0  ;;  %s1628_s18 = smov [#allocation6]   ;;  %s1629_s20 = smov [#allocation3]  }
   0x5   :  { %s32_s19 = sshll.u32 %s1628_s18, 4  ;;  %s22_s21 = sshll.u32 %s1629_s20, 4  ;;  %s33_s19 = int_to_ptr.vmem [resolvable:$true] %s32_s19  ;;  %s23_s21 = int_to_ptr.vmem [resolvable:$true] %s22_s21 }
   0x6   :  { %s1486_s24 = scalar_lea.hbm %s1824_s1, 128 }
   0x7   :  { %p1487_p0 = scmp.ne.s32.totalorder %s1824_s1, %s1486_s24  ;;  %p1490_p1 = scmp.lt.u32.totalorder %s1486_s24, %s1824_s1 }
   0x9   :  { %p1492_p2 = pnand %p1490_p1, %p1487_p0 }
   0xb   :  { %1495 = shalt.err (!%p1492_p2)
}
   0xc   :  { %s1496_s29 = scalar_lea.vmem %s33_s19, 128  ;;  %p1501_p4 = scmp.lt.s32.totalorder %s33_s19, %s33_s19 }
   0xd   :  { %p1497_p3 = scmp.ne.s32.totalorder %s33_s19, %s1496_s29  ;;  %p1502_p5 = scmp.lt.s32.totalorder %s1496_s29, %s1496_s29 }
   0xf   :  { %p1503_p6 = por %p1502_p5, %p1501_p4 }
  0x11   :  { %p1504_p7 = pnand %p1503_p6, %p1497_p3 }
  0x13   :  { %1507 = shalt.err (!%p1504_p7)
}
  0x14   :  { %35 = dma.hbm_to_vmem [thread:$0]  %s1824_s1, 128, %s33_s19, [#allocation7]  }
  0x15   :  { %s1508_s9 = scalar_lea.hbm %s1823_s0, 128 }
  0x16   :  { %p1509_p8 = scmp.ne.s32.totalorder %s1823_s0, %s1508_s9  ;;  %p1512_p9 = scmp.lt.u32.totalorder %s1508_s9, %s1823_s0 }
  0x18   :  { %p1514_p10 = pnand %p1512_p9, %p1509_p8 }
  0x1a   :  { %1517 = shalt.err (!%p1514_p10)
}
  0x1b   :  { %s1518_s14 = scalar_lea.vmem %s23_s21, 128  ;;  %p1523_p12 = scmp.lt.s32.totalorder %s23_s21, %s23_s21 }
  0x1c   :  { %p1519_p11 = scmp.ne.s32.totalorder %s23_s21, %s1518_s14  ;;  %p1524_p13 = scmp.lt.s32.totalorder %s1518_s14, %s1518_s14 }
  0x1e   :  { %p1525_p0 = por %p1524_p13, %p1523_p12 }
  0x20   :  { %p1526_p1 = pnand %p1525_p0, %p1519_p11 }
  0x22   :  { %1529 = shalt.err (!%p1526_p1)
}
  0x23   :  { %25 = dma.hbm_to_vmem [thread:$0]  %s1823_s0, 128, %s23_s21, [#allocation4]  }
  0x24   :  { %s1630_s16 = smov [#allocation8]   ;;  %s1530_s20 = scalar_lea.hbm %s1825_s2, 9728 }
  0x25   :  { %s41_s17 = sshll.u32 %s1630_s16, 4  ;;  %p1531_p2 = scmp.ne.s32.totalorder %s1825_s2, %s1530_s20  ;;  %s42_s17 = int_to_ptr.vmem [resolvable:$true] %s41_s17 }
  0x26   :  { %p1534_p3 = scmp.lt.u32.totalorder %s1530_s20, %s1825_s2 }
  0x28   :  { %p1536_p4 = pnand %p1534_p3, %p1531_p2 }
  0x2a   :  { %1539 = shalt.err (!%p1536_p4)
}
  0x2b   :  { %s1540_s26 = scalar_lea.vmem %s42_s17, 9728  ;;  %p1545_p6 = scmp.lt.s32.totalorder %s42_s17, %s42_s17 }
  0x2c   :  { %p1541_p5 = scmp.ne.s32.totalorder %s42_s17, %s1540_s26  ;;  %p1546_p7 = scmp.lt.s32.totalorder %s1540_s26, %s1540_s26 }
  0x2e   :  { %p1547_p8 = por %p1546_p7, %p1545_p6 }
  0x30   :  { %p1548_p9 = pnand %p1547_p8, %p1541_p5 }
  0x32   :  { %1551 = shalt.err (!%p1548_p9)
}
  0x33   :  { %s1631_s0 = smov 256   ;;  %s1632_s21 = smov 16  }
  0x34   :  { %47 = dma.hbm_to_vmem [thread:$0]  %s1825_s2, 9728, %s42_s17, [#allocation7], %s1631_s0, %s1631_s0, %s1632_s21  }
  0x35   :  { %s1633_s29 = smov [#allocation9]   ;;  %s1552_s8 = scalar_lea.hbm %s1826_s3, 512 }
  0x36   :  { %s54_s30 = sshll.u32 %s1633_s29, 4  ;;  %p1553_p10 = scmp.ne.s32.totalorder %s1826_s3, %s1552_s8  ;;  %s55_s30 = int_to_ptr.vmem [resolvable:$true] %s54_s30 }
  0x37   :  { %p1556_p11 = scmp.lt.u32.totalorder %s1552_s8, %s1826_s3 }
  0x39   :  { %p1558_p12 = pnand %p1556_p11, %p1553_p10 }
  0x3b   :  { %1561 = shalt.err (!%p1558_p12)
}
  0x3c   :  { %s1562_s13 = scalar_lea.vmem %s55_s30, 512  ;;  %p1567_p0 = scmp.lt.s32.totalorder %s55_s30, %s55_s30 }
  0x3d   :  { %p1563_p13 = scmp.ne.s32.totalorder %s55_s30, %s1562_s13  ;;  %p1568_p1 = scmp.lt.s32.totalorder %s1562_s13, %s1562_s13 }
  0x3f   :  { %p1569_p2 = por %p1568_p1, %p1567_p0 }
  0x41   :  { %p1570_p3 = pnand %p1569_p2, %p1563_p13 }
  0x43   :  { %1573 = shalt.err (!%p1570_p3)
}
  0x44   :  { %57 = dma.hbm_to_vmem [thread:$0]  %s1826_s3, 512, %s55_s30, [#allocation10]  }
  0x45   :  { %1618 = dma.done.wait [#allocation4], 128  }
  0x46   :  { %1619 = vsyncadd [#allocation4], 4294967168 }
  0x47   :  { %1620 = dma.done.wait [#allocation7], 9856  }
  0x48   :  { %1621 = vsyncadd [#allocation7], 4294957440 }
  0x49   :  { %1622 = dma.done.wait [#allocation10], 512  }
  0x4a   :  { %1623 = vsyncadd [#allocation10], 4294966784  ;;  %v1634_v0 = vmov 0   ;;  %v1380_v1 = vld [vmem:[#allocation8 + $0x4] ss:$16 sps:$4 sm:$0xff]   ;;  %vm175_vm0 = vcmask 392192   ;;  %v95_v54 = vlaneseq }
  0x4b   :  { %211 = vmatprep.mubr.bf16.mxu1 %v1634_v0  ;;  %471 = vmatprep.mubr.bf16.mxu0 %v1634_v0  ;;  %v1382_v2 = vld [vmem:[#allocation8 + $0x64] ss:$16 sps:$4 sm:$0xff]   ;;  %v1384_v3 = vld [vmem:[#allocation8] ss:$16 sps:$4 sm:$0xff]   ;;  %v1400_v14 = vld [vmem:[#allocation8 + $0xc] ss:$16 sps:$4 sm:$0xff]  }
  0x4c   :  { %179 = vmatprep.subr.bf16.mxu1 %v1380_v1  ;;  %v1385_v4 = vld [vmem:[#allocation8 + $0x60] ss:$16 sps:$4 sm:$0xff]   ;;  %439 = vmatprep.subr.bf16.mxu0 %v1382_v2  ;;  %v1386_v5 = vld [vmem:[#allocation8 + $0x24] ss:$16 sps:$4 sm:$0xff]   ;;  %v1398_v17 = vld [vmem:[#allocation8 + $0x8] ss:$16 sps:$4 sm:$0xff]  }
  0x4d   :  { %180 = vmatpush1.bf16.msra.mxu1 %v1384_v3  ;;  %440 = vmatpush1.bf16.msra.mxu0 %v1385_v4  ;;  %v1388_v6 = vld [vmem:[#allocation8 + $0x84] ss:$16 sps:$4 sm:$0xff]   ;;  %v1390_v7 = vld [vmem:[#allocation8 + $0x20] ss:$16 sps:$4 sm:$0xff]   ;;  %v1406_v19 = vld [vmem:[#allocation8 + $0x2c] ss:$16 sps:$4 sm:$0xff]  }
  0x4e   :  { %181 = vmatprep.subr.bf16.mxu1 %v1386_v5  ;;  %v1391_v8 = vld [vmem:[#allocation8 + $0x80] ss:$16 sps:$4 sm:$0xff]   ;;  %441 = vmatprep.subr.bf16.mxu0 %v1388_v6  ;;  %v1392_v9 = vld [vmem:[#allocation8 + $0x44] ss:$16 sps:$4 sm:$0xff]   ;;  %v1404_v21 = vld [vmem:[#allocation8 + $0x28] ss:$16 sps:$4 sm:$0xff]  }
  0x4f   :  { %v1394_v10 = vld [vmem:[#allocation8 + $0xa4] ss:$16 sps:$4 sm:$0xff]   ;;  %v1396_v11 = vld [vmem:[#allocation8 + $0x40] ss:$16 sps:$4 sm:$0xff]   ;;  %v1412_v23 = vld [vmem:[#allocation8 + $0x4c] ss:$16 sps:$4 sm:$0xff]  }
  0x50   :  { %v1397_v12 = vld [vmem:[#allocation8 + $0xa0] ss:$16 sps:$4 sm:$0xff]   ;;  %v1401_v15 = vld [vmem:[#allocation8 + $0xc4] ss:$16 sps:$4 sm:$0xff]   ;;  %v1410_v25 = vld [vmem:[#allocation8 + $0x48] ss:$16 sps:$4 sm:$0xff]  }
  0x51   :  { %182 = vmatpush1.bf16.msra.mxu1 %v1390_v7  ;;  %442 = vmatpush1.bf16.msra.mxu0 %v1391_v8  ;;  %v77_v13 = vld [vmem:[#allocation3] sm:$0xff]  ;;  %v1419_v29 = vld [vmem:[#allocation8 + $0x68] ss:$16 sps:$4 sm:$0xff]   ;;  %v1635_v30 = vmov 0.0   ;;  %vm1636_vm1 = vmmov 0   ;;  %v1751_v58 = vshrl.u32 %v95_v54, 7 }
  0x52   :  { %183 = vmatprep.subr.bf16.mxu1 %v1392_v9  ;;  %443 = vmatprep.subr.bf16.mxu0 %v1394_v10  ;;  %v78_v16 = vpack.c.bf16 %v77_v13, %v77_v13  ;;  %v1403_v18 = vld [vmem:[#allocation8 + $0xc0] ss:$16 sps:$4 sm:$0xff]   ;;  %v1407_v20 = vld [vmem:[#allocation8 + $0xe4] ss:$16 sps:$4 sm:$0xff]   ;;  %v1423_v33 = vld [vmem:[#allocation8 + $0x88] ss:$16 sps:$4 sm:$0xff]  }
  0x53   :  { %v1409_v22 = vld [vmem:[#allocation8 + $0xe0] ss:$16 sps:$4 sm:$0xff]   ;;  %v1413_v24 = vld [vmem:[#allocation8 + $0x104] ss:$16 sps:$4 sm:$0xff]   ;;  %v1720_v34 = vld [vmem:[#allocation6] sm:$0xff]  ;;  %v97_v60 = vsub.s32 0, %v1751_v58 }
  0x54   :  { %v1415_v26 = vld [vmem:[#allocation8 + $0x100] ss:$16 sps:$4 sm:$0xff]   ;;  %v1416_v27 = vld [vmem:[#allocation8 + $0x124] ss:$16 sps:$4 sm:$0xff]   ;;  %v1424_v35 = vld [vmem:[#allocation8 + $0xa8] ss:$16 sps:$4 sm:$0xff]   ;;  %v80_v36 = vpack.c.bf16 %v1720_v34, %v1720_v34 }
  0x55   :  { %184 = vmatpush1.bf16.msra.mxu1 %v1396_v11  ;;  %444 = vmatpush1.bf16.msra.mxu0 %v1397_v12  ;;  %v1418_v28 = vld [vmem:[#allocation8 + $0x120] ss:$16 sps:$4 sm:$0xff]   ;;  %v1420_v31 = vld [vmem:[#allocation8 + $0x144] ss:$16 sps:$4 sm:$0xff]   ;;  %v1425_v37 = vld [vmem:[#allocation8 + $0xc8] ss:$16 sps:$4 sm:$0xff]  }
  0x56   :  { %220 = vmatprep.subr.bf16.mxu1 %v1400_v14  ;;  %445 = vmatprep.subr.bf16.mxu0 %v1401_v15  ;;  %v1422_v32 = vld [vmem:[#allocation8 + $0x140] ss:$16 sps:$4 sm:$0xff]   ;;  %v1426_v38 = vld [vmem:[#allocation8 + $0xe8] ss:$16 sps:$4 sm:$0xff]   ;;  %v1430_v42 = vld [vmem:[#allocation8 + $0x6c] ss:$16 sps:$4 sm:$0xff]  }
  0x57   :  { %v1427_v39 = vld [vmem:[#allocation8 + $0x108] ss:$16 sps:$4 sm:$0xff]   ;;  %v1431_v43 = vld [vmem:[#allocation8 + $0x8c] ss:$16 sps:$4 sm:$0xff]   ;;  %v1438_v50 = vld [vmem:[#allocation8 + $0x160] ss:$16 sps:$4 sm:$0xff]  }
  0x58   :  { %1121 = vmatmul.mubr.msk.bf16.vlgmr.msra.gmra.mrb[0].mxu1 %vm175_vm0, %v78_v16  ;;  %v1428_v40 = vld [vmem:[#allocation8 + $0x128] ss:$16 sps:$4 sm:$0xff]   ;;  %v1432_v44 = vld [vmem:[#allocation8 + $0xac] ss:$16 sps:$4 sm:$0xff]   ;;  %v1439_v51 = vld [vmem:[#allocation8 + $0x180] ss:$16 sps:$4 sm:$0xff]  }
  0x59   :  { %221 = vmatpush1.bf16.msra.mxu1 %v1398_v17  ;;  %446 = vmatpush1.bf16.msra.mxu0 %v1403_v18  ;;  %v1429_v41 = vld [vmem:[#allocation8 + $0x148] ss:$16 sps:$4 sm:$0xff]   ;;  %v1433_v45 = vld [vmem:[#allocation8 + $0xcc] ss:$16 sps:$4 sm:$0xff]   ;;  %v1440_v52 = vld [vmem:[#allocation8 + $0x1a0] ss:$16 sps:$4 sm:$0xff]  }
  0x5a   :  { %222 = vmatprep.subr.bf16.mxu1 %v1406_v19  ;;  %447 = vmatprep.subr.bf16.mxu0 %v1407_v20  ;;  %v1434_v46 = vld [vmem:[#allocation8 + $0xec] ss:$16 sps:$4 sm:$0xff]   ;;  %v1441_v53 = vld [vmem:[#allocation8 + $0x1c0] ss:$16 sps:$4 sm:$0xff]   ;;  %v101_v62 = vsub.s32 1, %v1751_v58  ;;  %s1637_s3 = smov [#allocation12]  }
  0x5b   :  { %252 = vmatprep.mubr.bf16.mxu1 %v1634_v0  ;;  %v1435_v47 = vld [vmem:[#allocation8 + $0x10c] ss:$16 sps:$4 sm:$0xff]   ;;  %v1754_v61 = vld [vmem:[#allocation9] ss:$8 sm:$0xf]  ;;  %s1094_s1 = sshll.u32 %s1637_s3, 4  ;;  %s1095_s1 = int_to_ptr.vmem [resolvable:$true] %s1094_s1 }
  0x5c   :  { %v1436_v48 = vld [vmem:[#allocation8 + $0x12c] ss:$16 sps:$4 sm:$0xff]   ;;  %v98_v63 = vrot.slane %v1754_v61, %v97_v60  ;;  %v102_v0 = vrot.slane %v1754_v61, %v101_v62  ;;  %v294_v2 = vld [vmem:[#allocation9 + $0x1] ss:$8 sm:$0x7]  ;;  %s1574_s15 = scalar_lea.vmem %s1095_s1, 128  ;;  %p1579_p5 = scmp.lt.s32.totalorder %s1095_s1, %s1095_s1 }
  0x5d   :  { %223 = vmatpush1.bf16.msra.mxu1 %v1404_v21  ;;  %448 = vmatpush1.bf16.msra.mxu0 %v1409_v22  ;;  %v1437_v49 = vld [vmem:[#allocation8 + $0x14c] ss:$16 sps:$4 sm:$0xff]   ;;  %v299_v7 = vrot.slane %v294_v2, %v97_v60  ;;  %v303_v9 = vrot.slane %v294_v2, %v101_v62  ;;  %v105_v22 = vsub.s32 2, %v1751_v58  ;;  %p1575_p4 = scmp.ne.s32.totalorder %s1095_s1, %s1574_s15  ;;  %p1580_p6 = scmp.lt.s32.totalorder %s1574_s15, %s1574_s15 }
  0x5e   :  { %224 = vmatprep.subr.bf16.mxu1 %v1412_v23  ;;  %449 = vmatprep.subr.bf16.mxu0 %v1413_v24 }
  0x5f   :  { %v307_v23 = vrot.slane %v294_v2, %v105_v22  ;;  %v1450_v2 = vld [vmem:[#allocation8 + $0x1e4] ss:$16 sps:$4 sm:$0xff]   ;;  %p1581_p7 = por %p1580_p6, %p1579_p5 }
  0x61   :  { %225 = vmatpush1.bf16.msra.mxu1 %v1410_v25  ;;  %450 = vmatpush1.bf16.msra.mxu0 %v1415_v26  ;;  %v106_v26 = vrot.slane %v1754_v61, %v105_v22  ;;  %v1464_v22 = vld [vmem:[#allocation8 + $0x1ac] ss:$16 sps:$4 sm:$0xff]   ;;  %p1582_p8 = pnand %p1581_p7, %p1575_p4 }
  0x62   :  { %451 = vmatprep.subr.bf16.mxu0 %v1416_v27  ;;  %1243 = vmatprep.subr.bf16.mxu1 %v1635_v30 }
  0x64   :  { %1122 = vmatmul.mubr.msk.bf16.vlgmr.msra.gmra.mrb[4].mxu1 %vm175_vm0, %v78_v16 }
  0x65   :  { %452 = vmatpush1.bf16.msra.mxu0 %v1418_v28  ;;  %1244 = vmatpush3.bf16.msra.mxu1 %v1419_v29 }
  0x66   :  { %453 = vmatprep.subr.bf16.mxu0 %v1420_v31  ;;  %1245 = vmatprep.subr.bf16.mxu1 %v1635_v30 }
  0x67   :  { %1259 = vmatprep.mubr.msk.bf16.mxu1 %vm1636_vm1, %v1635_v30 }
  0x69   :  { %454 = vmatpush1.bf16.msra.mxu0 %v1422_v32  ;;  %1246 = vmatpush3.bf16.msra.mxu1 %v1423_v33 }
  0x6a   :  { %1247 = vmatprep.subr.bf16.mxu1 %v1635_v30  ;;  %1263 = vmatprep.subr.bf16.mxu0 %v1635_v30 }
  0x6c   :  { %472 = vmatmul.mubr.bf16.vlgmr.msra.gmra.mrb[0].mxu0 %v80_v36 }
  0x6d   :  { %1248 = vmatpush3.bf16.msra.mxu1 %v1424_v35  ;;  %1279 = vmatprep.mubr.msk.bf16.mxu0 %vm1636_vm1, %v1635_v30 }
  0x6e   :  { %1249 = vmatprep.subr.bf16.mxu1 %v1635_v30  ;;  %1264 = vmatpush3.bf16.msra.mxu0 %v1430_v42 }
  0x6f   :  { %1265 = vmatprep.subr.bf16.mxu0 %v1635_v30 }
  0x71   :  { %1250 = vmatpush3.bf16.msra.mxu1 %v1425_v37 }
  0x72   :  { %1251 = vmatprep.subr.bf16.mxu1 %v1635_v30  ;;  %1266 = vmatpush3.bf16.msra.mxu0 %v1431_v43 }
  0x73   :  { %1267 = vmatprep.subr.bf16.mxu0 %v1635_v30 }
  0x75   :  { %1252 = vmatpush3.bf16.msra.mxu1 %v1426_v38 }
  0x76   :  { %1253 = vmatprep.subr.bf16.mxu1 %v1635_v30  ;;  %1268 = vmatpush3.bf16.msra.mxu0 %v1432_v44 }
  0x77   :  { %1269 = vmatprep.subr.bf16.mxu0 %v1635_v30 }
  0x79   :  { %1254 = vmatpush3.bf16.msra.mxu1 %v1427_v39 }
  0x7a   :  { %1255 = vmatprep.subr.bf16.mxu1 %v1635_v30  ;;  %1270 = vmatpush3.bf16.msra.mxu0 %v1433_v45  ;;  %v1442_v45 = vld [vmem:[#allocation8 + $0x1e0] ss:$16 sps:$4 sm:$0xff]  }
  0x7b   :  { %1271 = vmatprep.subr.bf16.mxu0 %v1635_v30 }
  0x7d   :  { %1256 = vmatpush3.bf16.msra.mxu1 %v1428_v40 }
  0x7e   :  { %1257 = vmatprep.subr.bf16.mxu1 %v1635_v30  ;;  %1272 = vmatpush3.bf16.msra.mxu0 %v1434_v46  ;;  %v1443_v46 = vld [vmem:[#allocation8 + $0x200] ss:$16 sps:$4 sm:$0xff]  }
  0x7f   :  { %1273 = vmatprep.subr.bf16.mxu0 %v1635_v30 }
  0x81   :  { %1258 = vmatpush3.bf16.msra.mxu1 %v1429_v41 }
  0x82   :  { %1283 = vmatprep.subr.bf16.mxu1 %v1635_v30  ;;  %1274 = vmatpush3.bf16.msra.mxu0 %v1435_v47  ;;  %v1444_v47 = vld [vmem:[#allocation8 + $0x220] ss:$16 sps:$4 sm:$0xff]  }
  0x83   :  { %1275 = vmatprep.subr.bf16.mxu0 %v1635_v30 }
  0x84   :  { %1260 = vmatmul.mubr.bf16.vlgmr.msra.gmra.mrb[8].mxu1 %v80_v36 }
  0x85   :  { %1299 = vmatprep.mubr.msk.bf16.mxu1 %vm1636_vm1, %v1635_v30  ;;  %1284 = vmatpush3.bf16.msra.mxu1 %v1438_v50  ;;  %v1448_v50 = vld [vmem:[#allocation8 + $0x1a4] ss:$16 sps:$4 sm:$0xff]  }
  0x86   :  { %1276 = vmatpush3.bf16.msra.mxu0 %v1436_v48  ;;  %1285 = vmatprep.subr.bf16.mxu1 %v1635_v30  ;;  %v1446_v48 = vld [vmem:[#allocation8 + $0x164] ss:$16 sps:$4 sm:$0xff]  }
  0x87   :  { %1277 = vmatprep.subr.bf16.mxu0 %v1635_v30 }
  0x89   :  { %1286 = vmatpush3.bf16.msra.mxu1 %v1439_v51  ;;  %v1449_v51 = vld [vmem:[#allocation8 + $0x1c4] ss:$16 sps:$4 sm:$0xff]  }
  0x8a   :  { %1278 = vmatpush3.bf16.msra.mxu0 %v1437_v49  ;;  %1287 = vmatprep.subr.bf16.mxu1 %v1635_v30  ;;  %v1447_v49 = vld [vmem:[#allocation8 + $0x184] ss:$16 sps:$4 sm:$0xff]  }
  0x8b   :  { %1303 = vmatprep.subr.bf16.mxu0 %v1635_v30 }
  0x8d   :  { %1288 = vmatpush3.bf16.msra.mxu1 %v1440_v52  ;;  %v109_v52 = vsub.s32 3, %v1751_v58  ;;  %v1451_v58 = vld [vmem:[#allocation8 + $0x204] ss:$16 sps:$4 sm:$0xff]  }
  0x8e   :  { %1289 = vmatprep.subr.bf16.mxu1 %v1635_v30 }
  0x91   :  { %1290 = vmatpush3.bf16.msra.mxu1 %v1441_v53  ;;  %v110_v53 = vrot.slane %v1754_v61, %v109_v52  ;;  %v1452_v61 = vld [vmem:[#allocation8 + $0x224] ss:$16 sps:$4 sm:$0xff]  }
  0x92   :  { %1291 = vmatprep.subr.bf16.mxu1 %v1635_v30 }
  0x95   :  { %1292 = vmatpush3.bf16.msra.mxu1 %v1442_v45 }
  0x96   :  { %1293 = vmatprep.subr.bf16.mxu1 %v1635_v30 }
  0x99   :  { %1294 = vmatpush3.bf16.msra.mxu1 %v1443_v46 }
  0x9a   :  { %1295 = vmatprep.subr.bf16.mxu1 %v1635_v30 }
  0x9d   :  { %1296 = vmatpush3.bf16.msra.mxu1 %v1444_v47 }
  0x9e   :  { %1297 = vmatprep.subr.bf16.mxu1 %v1635_v30 }
 0x12b   :  { %v213_v55 = vpop.f32.mrb[0].mxu1 }
 0x12c   :  { %v215_v56 = vpop.f32.mrb[1].mxu1  ;;  %v214_v5 = vadd.f32 %v213_v55, %v98_v63 }
 0x12d   :  { %v217_v57 = vpop.f32.mrb[2].mxu1  ;;  %v216_v8 = vadd.f32 %v215_v56, %v102_v0  ;;  %v648_v56 = vld [vmem:[#allocation9 + $0x2] ss:$0 sm:$0xff] }
 0x12e   :  { %v218_v59 = vpop.f32.mrb[3].mxu1  ;;  %v1364_v10 = vadd.f32 %v299_v7, %v214_v5  ;;  %v1455_v5 = vld [vmem:[#allocation8 + $0x188] ss:$16 sps:$4 sm:$0xff]  }
 0x12f   :  { %v1367_v12 = vadd.f32 %v303_v9, %v216_v8  ;;  %v1457_v7 = vld [vmem:[#allocation8 + $0x1c8] ss:$16 sps:$4 sm:$0xff]   ;;  %v668_v8 = vld [vmem:[#allocation9 + $0x3] ss:$0 sm:$0xff] }
 0x137   :  { %v254_v1 = vpop.f32.mrb[4].mxu1 }
 0x138   :  { %v1759_v3 = vpop.f32.mrb[5].mxu1  ;;  %v255_v35 = vadd.f32 %v254_v1, %v106_v26  ;;  %v1468_v26 = vld [vmem:[#allocation8 + $0x22c] ss:$16 sps:$4 sm:$0xff]  }
 0x139   :  { %v258_v4 = vpop.f32.mrb[6].mxu1  ;;  %v257_v54 = vadd.f32 %v1759_v3, %v110_v53  ;;  %v1453_v3 = vld [vmem:[#allocation8 + $0x244] ss:$16 sps:$4 sm:$0xff]  }
 0x13a   :  { %v259_v6 = vpop.f32.mrb[7].mxu1  ;;  %v1454_v4 = vld [vmem:[#allocation8 + $0x168] ss:$16 sps:$4 sm:$0xff]  }
 0x13b   :  { %v1456_v6 = vld [vmem:[#allocation8 + $0x1a8] ss:$16 sps:$4 sm:$0xff]  }
 0x13f   :  { %v473_v11 = vpop.f32.mrb[0].mxu0 }
 0x140   :  { %v1365_v13 = vadd.f32 %v1364_v10, %v473_v11  ;;  %v475_v14 = vpop.f32.mrb[1].mxu0 }
 0x141   :  { %v1368_v15 = vadd.f32 %v1367_v12, %v475_v14  ;;  %v477_v16 = vpop.f32.mrb[2].mxu0 }
 0x142   :  { %v1147_v17 = vmul.f32 -1.442695, %v1365_v13  ;;  %v478_v18 = vpop.f32.mrb[3].mxu0  ;;  %v1458_v16 = vld [vmem:[#allocation8 + $0x1e8] ss:$16 sps:$4 sm:$0xff]  }
 0x143   :  { %v1148_v19 = vmul.f32 -1.442695, %v1368_v15  ;;  %v1460_v18 = vld [vmem:[#allocation8 + $0x228] ss:$16 sps:$4 sm:$0xff]  }
 0x144   :  { %1470 = vpow2.f32 %v1147_v17  ;;  %v1459_v17 = vld [vmem:[#allocation8 + $0x208] ss:$16 sps:$4 sm:$0xff]  }
 0x145   :  { %1472 = vpow2.f32 %v1148_v19  ;;  %v1461_v19 = vld [vmem:[#allocation8 + $0x248] ss:$16 sps:$4 sm:$0xff]  }
 0x14e   :  { %v1471_v20 = vpop.eup %1470 }
 0x14f   :  { %v524_v21 = vadd.f32 1.0, %v1471_v20  ;;  %v1473_v24 = vpop.eup %1472  ;;  %v1462_v20 = vld [vmem:[#allocation8 + $0x16c] ss:$16 sps:$4 sm:$0xff]  }
 0x150   :  { %v531_v27 = vadd.f32 1.0, %v1473_v24  ;;  %v1466_v24 = vld [vmem:[#allocation8 + $0x1ec] ss:$16 sps:$4 sm:$0xff]  }
 0x151   :  { %1474 = vrcp.f32 %v524_v21  ;;  %v1463_v21 = vld [vmem:[#allocation8 + $0x18c] ss:$16 sps:$4 sm:$0xff]  }
 0x152   :  { %1476 = vrcp.f32 %v531_v27  ;;  %v775_v27 = vld [vmem:[#allocation9 + $0x4] ss:$0 sm:$0xff] }
 0x157   :  { %v514_v25 = vpop.f32.mrb[8].mxu1 }
 0x158   :  { %v515_v28 = vadd.f32 %v514_v25, %v307_v23  ;;  %v1261_v29 = vpop.f32.mrb[9].mxu1  ;;  %v1465_v23 = vld [vmem:[#allocation8 + $0x1cc] ss:$16 sps:$4 sm:$0xff]  }
 0x159   :  { %v517_v31 = vpop.f32.mrb[10].mxu1  ;;  %v1467_v25 = vld [vmem:[#allocation8 + $0x20c] ss:$16 sps:$4 sm:$0xff]  }
 0x15a   :  { %v1262_v32 = vpop.f32.mrb[11].mxu1 }
 0x15b   :  { %v1475_v33 = vpop.eup %1474 }
 0x15c   :  { %v534_v36 = vmul.f32 %v1475_v33, %v515_v28  ;;  %v1477_v38 = vpop.eup %1476 }
 0x15d   :  { %v537_v39 = vsub.f32 1.0, %v1477_v38  ;;  %v539_v42 = vmul.f32 %v1477_v38, %v1720_v34  ;;  %v1445_v34 = vld [vmem:[#allocation8 + $0x240] ss:$16 sps:$4 sm:$0xff]   ;;  %v882_v38 = vld [vmem:[#allocation9 + $0x5] ss:$0 sm:$0xff] }
 0x15e   :  { %v535_v37 = vadd.f32 %v534_v36, %v255_v35  ;;  %1298 = vmatpush3.bf16.msra.mxu1 %v1445_v34 }
 0x15f   :  { %1323 = vmatprep.subr.bf16.mxu1 %v1635_v30 }
 0x160   :  { %1478 = vtanh.f32 %v535_v37  ;;  %v1469_v37 = vld [vmem:[#allocation8 + $0x24c] ss:$16 sps:$4 sm:$0xff]  }
 0x16a   :  { %v1479_v40 = vpop.eup %1478 }
 0x16b   :  { %v538_v41 = vmul.f32 %v1479_v40, %v537_v39 }
 0x16d   :  { %v540_v43 = vadd.f32 %v539_v42, %v538_v41 }
 0x16f   :  { %v543_v44 = vpack.c.bf16 %v540_v43, %v540_v43  ;;  %542 = vst [vmem:[#allocation12] sm:$0xff] %v540_v43 }
 0x171   :  { %1280 = vmatmul.mubr.bf16.vlgmr.msra.gmra.mrb[4].mxu0 %v543_v44 }
 0x172   :  { %1319 = vmatprep.mubr.msk.bf16.mxu0 %vm1636_vm1, %v1635_v30  ;;  %1304 = vmatpush3.bf16.msra.mxu0 %v1446_v48 }
 0x173   :  { %1305 = vmatprep.subr.bf16.mxu0 %v1635_v30 }
 0x176   :  { %1306 = vmatpush3.bf16.msra.mxu0 %v1447_v49 }
 0x177   :  { %1307 = vmatprep.subr.bf16.mxu0 %v1635_v30 }
 0x17a   :  { %1308 = vmatpush3.bf16.msra.mxu0 %v1448_v50 }
 0x17b   :  { %1309 = vmatprep.subr.bf16.mxu0 %v1635_v30 }
 0x17e   :  { %1310 = vmatpush3.bf16.msra.mxu0 %v1449_v51 }
 0x17f   :  { %1311 = vmatprep.subr.bf16.mxu0 %v1635_v30 }
 0x182   :  { %1312 = vmatpush3.bf16.msra.mxu0 %v1450_v2 }
 0x183   :  { %1313 = vmatprep.subr.bf16.mxu0 %v1635_v30 }
 0x186   :  { %1314 = vmatpush3.bf16.msra.mxu0 %v1451_v58 }
 0x187   :  { %1315 = vmatprep.subr.bf16.mxu0 %v1635_v30 }
 0x18a   :  { %1316 = vmatpush3.bf16.msra.mxu0 %v1452_v61 }
 0x18b   :  { %1317 = vmatprep.subr.bf16.mxu0 %v1635_v30 }
 0x18e   :  { %1318 = vmatpush3.bf16.msra.mxu0 %v1453_v3 }
 0x18f   :  { %1343 = vmatprep.subr.bf16.mxu0 %v1635_v30 }
 0x244   :  { %v642_v55 = vpop.f32.mrb[4].mxu0 }
 0x245   :  { %v643_v57 = vadd.f32 %v642_v55, %v257_v54  ;;  %v1281_v59 = vpop.f32.mrb[5].mxu0 }
 0x246   :  { %v645_v60 = vpop.f32.mrb[6].mxu0 }
 0x247   :  { %v649_v62 = vadd.f32 %v648_v56, %v643_v57  ;;  %v1282_v63 = vpop.f32.mrb[7].mxu0 }
 0x249   :  { %1480 = vtanh.f32 %v649_v62 }
 0x253   :  { %v1481_v0 = vpop.eup %1480 }
 0x254   :  { %v651_v1 = vpack.c.bf16 %v1481_v0, %v1481_v0 }
 0x256   :  { %1300 = vmatmul.mubr.bf16.vlgmr.msra.gmra.mrb[12].mxu1 %v651_v1 }
 0x257   :  { %1339 = vmatprep.mubr.msk.bf16.mxu1 %vm1636_vm1, %v1635_v30  ;;  %1324 = vmatpush3.bf16.msra.mxu1 %v1454_v4 }
 0x258   :  { %1325 = vmatprep.subr.bf16.mxu1 %v1635_v30 }
 0x25b   :  { %1326 = vmatpush3.bf16.msra.mxu1 %v1455_v5 }
 0x25c   :  { %1327 = vmatprep.subr.bf16.mxu1 %v1635_v30 }
 0x25f   :  { %1328 = vmatpush3.bf16.msra.mxu1 %v1456_v6 }
 0x260   :  { %1329 = vmatprep.subr.bf16.mxu1 %v1635_v30 }
 0x263   :  { %1330 = vmatpush3.bf16.msra.mxu1 %v1457_v7 }
 0x264   :  { %1331 = vmatprep.subr.bf16.mxu1 %v1635_v30 }
 0x267   :  { %1332 = vmatpush3.bf16.msra.mxu1 %v1458_v16 }
 0x268   :  { %1333 = vmatprep.subr.bf16.mxu1 %v1635_v30 }
 0x26b   :  { %1334 = vmatpush3.bf16.msra.mxu1 %v1459_v17 }
 0x26c   :  { %1335 = vmatprep.subr.bf16.mxu1 %v1635_v30 }
 0x26f   :  { %1336 = vmatpush3.bf16.msra.mxu1 %v1460_v18 }
 0x270   :  { %1337 = vmatprep.subr.bf16.mxu1 %v1635_v30 }
 0x273   :  { %1338 = vmatpush3.bf16.msra.mxu1 %v1461_v19 }
 0x329   :  { %v751_v9 = vpop.f32.mrb[12].mxu1 }
 0x32a   :  { %v752_v10 = vadd.f32 %v751_v9, %v668_v8  ;;  %v1301_v11 = vpop.f32.mrb[13].mxu1 }
 0x32b   :  { %v754_v12 = vpop.f32.mrb[14].mxu1 }
 0x32c   :  { %1482 = vtanh.f32 %v752_v10  ;;  %v1302_v13 = vpop.f32.mrb[15].mxu1 }
 0x336   :  { %v1483_v14 = vpop.eup %1482 }
 0x337   :  { %v758_v15 = vpack.c.bf16 %v1483_v14, %v1483_v14 }
 0x339   :  { %1320 = vmatmul.mubr.bf16.vlgmr.msra.gmra.mrb[8].mxu0 %v758_v15 }
 0x33a   :  { %1359 = vmatprep.mubr.msk.bf16.mxu0 %vm1636_vm1, %v1635_v30  ;;  %1344 = vmatpush3.bf16.msra.mxu0 %v1462_v20 }
 0x33b   :  { %1345 = vmatprep.subr.bf16.mxu0 %v1635_v30 }
 0x33e   :  { %1346 = vmatpush3.bf16.msra.mxu0 %v1463_v21 }
 0x33f   :  { %1347 = vmatprep.subr.bf16.mxu0 %v1635_v30 }
 0x342   :  { %1348 = vmatpush3.bf16.msra.mxu0 %v1464_v22 }
 0x343   :  { %1349 = vmatprep.subr.bf16.mxu0 %v1635_v30 }
 0x346   :  { %1350 = vmatpush3.bf16.msra.mxu0 %v1465_v23 }
 0x347   :  { %1351 = vmatprep.subr.bf16.mxu0 %v1635_v30 }
 0x34a   :  { %1352 = vmatpush3.bf16.msra.mxu0 %v1466_v24 }
 0x34b   :  { %1353 = vmatprep.subr.bf16.mxu0 %v1635_v30 }
 0x34e   :  { %1354 = vmatpush3.bf16.msra.mxu0 %v1467_v25 }
 0x34f   :  { %1355 = vmatprep.subr.bf16.mxu0 %v1635_v30 }
 0x352   :  { %1356 = vmatpush3.bf16.msra.mxu0 %v1468_v26 }
 0x353   :  { %1357 = vmatprep.subr.bf16.mxu0 %v1635_v30 }
 0x356   :  { %1358 = vmatpush3.bf16.msra.mxu0 %v1469_v37 }
 0x40c   :  { %v858_v28 = vpop.f32.mrb[8].mxu0 }
 0x40d   :  { %v859_v29 = vadd.f32 %v858_v28, %v775_v27  ;;  %v1321_v31 = vpop.f32.mrb[9].mxu0 }
 0x40e   :  { %v861_v32 = vpop.f32.mrb[10].mxu0 }
 0x40f   :  { %1484 = vtanh.f32 %v859_v29  ;;  %v1322_v33 = vpop.f32.mrb[11].mxu0 }
 0x419   :  { %v1485_v35 = vpop.eup %1484 }
 0x41a   :  { %v865_v36 = vpack.c.bf16 %v1485_v35, %v1485_v35 }
 0x41c   :  { %1340 = vmatmul.mubr.bf16.vlgmr.msra.gmra.mrb[16].mxu1 %v865_v36 }
 0x4ef   :  { %v965_v39 = vpop.f32.mrb[16].mxu1 }
 0x4f0   :  { %v966_v40 = vadd.f32 %v965_v39, %v882_v38  ;;  %v1341_v41 = vpop.f32.mrb[17].mxu1 }
 0x4f1   :  { %v968_v42 = vpop.f32.mrb[18].mxu1 }
 0x4f2   :  { %v971_v43 = vpack.c.bf16 %v966_v40, %v966_v40  ;;  %v1342_v44 = vpop.f32.mrb[19].mxu1 }
 0x4f4   :  { %1360 = vmatmul.mubr.bf16.vlgmr.msra.gmra.mrb[12].mxu0 %v971_v43 }
 0x4f5   :  { %1585 = shalt.err (!%p1582_p8)
}
 0x4f6   :  { %s1586_s18 = scalar_lea.hbm %s1828_s5, 128 }
 0x4f7   :  { %p1587_p9 = scmp.ne.s32.totalorder %s1828_s5, %s1586_s18  ;;  %p1590_p10 = scmp.lt.u32.totalorder %s1586_s18, %s1828_s5 }
 0x4f9   :  { %p1592_p11 = pnand %p1590_p10, %p1587_p9 }
 0x4fb   :  { %1595 = shalt.err (!%p1592_p11)
}
 0x4fc   :  { %1097 = dma.vmem_to_hbm [thread:$0]  %s1095_s1, 128, %s1828_s5, [#allocation13]   ;;  %v988_v30 = vld [vmem:[#allocation9 + $0x6] ss:$0 sm:$0xff] }
 0x4fd   :  { %s1638_s26 = smov [#allocation11]  }
 0x4fe   :  { %s1084_s0 = sshll.u32 %s1638_s26, 4  ;;  %s1085_s0 = int_to_ptr.vmem [resolvable:$true] %s1084_s0 }
 0x4ff   :  { %s1596_s21 = scalar_lea.vmem %s1085_s0, 128  ;;  %p1601_p13 = scmp.lt.s32.totalorder %s1085_s0, %s1085_s0 }
 0x500   :  { %p1597_p12 = scmp.ne.s32.totalorder %s1085_s0, %s1596_s21  ;;  %p1602_p0 = scmp.lt.s32.totalorder %s1596_s21, %s1596_s21 }
 0x502   :  { %p1603_p1 = por %p1602_p0, %p1601_p13 }
 0x504   :  { %p1604_p2 = pnand %p1603_p1, %p1597_p12 }
 0x5c7   :  { %v1071_v45 = vpop.f32.mrb[12].mxu0 }
 0x5c8   :  { %v1072_v46 = vadd.f32 %v1071_v45, %v988_v30  ;;  %v1361_v47 = vpop.f32.mrb[13].mxu0 }
 0x5c9   :  { %v1074_v34 = vpop.f32.mrb[14].mxu0 }
 0x5ca   :  { %1077 = vst [vmem:[#allocation11] sm:$0xff] %v1072_v46  ;;  %v1362_v48 = vpop.f32.mrb[15].mxu0 }
 0x5cb   :  { %1607 = shalt.err (!%p1604_p2)
}
 0x5cc   :  { %s1608_s5 = scalar_lea.hbm %s1827_s4, 128 }
 0x5cd   :  { %p1609_p3 = scmp.ne.s32.totalorder %s1827_s4, %s1608_s5  ;;  %p1612_p4 = scmp.lt.u32.totalorder %s1608_s5, %s1827_s4 }
 0x5cf   :  { %p1614_p5 = pnand %p1612_p4, %p1609_p3 }
 0x5d1   :  { %1617 = shalt.err (!%p1614_p5)
}
 0x5d2   :  { %1087 = dma.vmem_to_hbm [thread:$0]  %s1085_s0, 128, %s1827_s4, [#allocation5]  }
 0x5d3   :  { %1624 = dma.done.wait [#allocation5], 128  }
 0x5d4   :  { %1625 = vsyncadd [#allocation5], 4294967168 }
 0x5d5   :  { %1626 = dma.done.wait [#allocation13], 128  }
 0x5d6   :  { %1627 = vsyncadd [#allocation13], 4294967168 }
 0x5d7   :  { %1104 = vsyncpa [#allocation4], 1 }
 0x5d8   :  { %1105 = vsyncpa [#allocation7], 1 }
 0x5d9   :  { %1106 = vsyncpa [#allocation10], 1 }
 0x5da   :  { %1107 = vsyncpa [#allocation5], 1 }
 0x5db   :  { %1108 = vsyncpa [#allocation13], 1 }

</bundles_post_ra>
